<compile_context>
chip_gen: v7x
topology: tpu7x:2x2x1
jax: 0.10.0
libtpu: 0.0.40
codegen_flags: <defaults>
</compile_context>

<pallas_src>
import jax
import jax.numpy as jnp
from jax import lax
from jax.experimental import pallas as pl
from jax.experimental.pallas import tpu as pltpu


def _round_up(x, m):
    return (x + m - 1) // m * m


def _embedding_bag_fc_kernel(text_ref,   # VMEM [seq_pad, 1]          int32
                             start_ref,  # VMEM [nb_tile, 1]          int32
                             end_ref,    # VMEM [nb_tile, 1]          int32
                             emb_ref,    # VMEM [vocab_pad, embed_pad] (resident)
                             w_ref,      # VMEM [embed_pad, ncls_pad]
                             b_ref,      # VMEM [1, ncls_pad]          f32
                             out_ref):   # VMEM [nb_tile, ncls_pad]    f32
    seq_pad = text_ref.shape[0]
    nb_tile = out_ref.shape[0]
    vocab_pad = emb_ref.shape[0]
    cdt = emb_ref.dtype  # compute dtype for MXU operands (f32 or bf16)

    # ---- 1) One-hot token matrix [seq_pad, vocab_pad] on the VPU.
    # Padded token slots hold -1 -> all-zero one-hot row -> zero contribution.
    tok = text_ref[...]                                            # [seq_pad, 1]
    vcol = lax.broadcasted_iota(jnp.int32, (seq_pad, vocab_pad), 1)
    onehot = (vcol == tok).astype(cdt)

    # ---- 2) "Gather" all referenced rows with one MXU matmul (f32 accumulate).
    rows = jnp.dot(onehot, emb_ref[...],
                   preferred_element_type=jnp.float32)             # [seq_pad, embed_pad]

    # ---- 3) Segment-mean matrix [nb_tile, seq_pad]: row b holds 1/count(b)
    # over [start_b, end_b), 0 elsewhere.  Empty / padded bags -> all-zero row
    # -> zero mean (matches EmbeddingBag(mode='mean')).
    starts = start_ref[...]                                        # [nb_tile, 1]
    ends = end_ref[...]                                            # [nb_tile, 1]
    col = lax.broadcasted_iota(jnp.int32, (nb_tile, seq_pad), 1)
    counts = (ends - starts).astype(jnp.float32)
    inv = jnp.where(counts > 0.0, 1.0 / jnp.maximum(counts, 1.0), 0.0)
    seg = jnp.where((col >= starts) & (col < ends), inv, 0.0).astype(cdt)

    # ---- 4) All bag means in one MXU matmul.
    means = jnp.dot(seg, rows.astype(cdt),
                    preferred_element_type=jnp.float32)            # [nb_tile, embed_pad]

    # ---- 5) Batched FC + bias; single lane-dense (128-wide padded) store.
    out_ref[...] = (jnp.dot(means.astype(cdt), w_ref[...],
                            preferred_element_type=jnp.float32)
                    + b_ref[...].astype(jnp.float32)).astype(out_ref.dtype)


def make_text_classifier(emb_w, fc_w, fc_b, *, param_dtype=None, bag_tile=256):
    """Builds the forward fn.  All parameter prep (padding, transpose, dtype
    cast) happens here ONCE, not per call.

    emb_w: [vocab, embed_dim], fc_w: [num_cls, embed_dim] (PyTorch layout),
    fc_b: [num_cls].  Returns forward(text, offsets) -> [num_bags, num_cls] f32.
    """
    vocab, embed_dim = emb_w.shape
    num_cls = fc_w.shape[0]
    cdt = jnp.dtype(param_dtype) if param_dtype is not None else jnp.dtype(emb_w.dtype)

    vocab_pad = _round_up(vocab, 128)     # lane-dense one-hot / table contraction
    embed_pad = _round_up(embed_dim, 128)  # lane-dense rows/means (zero-padded cols)
    ncls_pad = _round_up(num_cls, 128)     # lane-dense FC output store

    # Zero-padded, pre-transposed parameters (padding keeps the math exact).
    emb_pad = jnp.zeros((vocab_pad, embed_pad), cdt)
    emb_pad = emb_pad.at[:vocab, :embed_dim].set(emb_w.astype(cdt))
    w_pad = jnp.zeros((embed_pad, ncls_pad), cdt)
    w_pad = w_pad.at[:embed_dim, :num_cls].set(fc_w.T.astype(cdt))
    b_pad = jnp.zeros((1, ncls_pad), jnp.float32)
    b_pad = b_pad.at[0, :num_cls].set(fc_b.astype(jnp.float32))

    itemsize = jnp.dtype(cdt).itemsize

    @jax.jit
    def forward(text, offsets):
        seq = text.shape[0]
        num_bags = offsets.shape[0]

        seq_pad = _round_up(seq, 8)
        nb_tile = min(_round_up(num_bags, 8), _round_up(bag_tile, 8))
        nb_pad = _round_up(num_bags, nb_tile)
        grid = (nb_pad // nb_tile,)

        # Padded token column (-1 -> zero one-hot row, zero contribution).
        text_p = jnp.full((seq_pad, 1), -1, jnp.int32)
        text_p = text_p.at[:seq, 0].set(text.astype(jnp.int32))

        # PyTorch EmbeddingBag semantics: offsets are sorted bag starts; the
        # last bag ends at seq.  Padded bags get start = end = 0 -> empty.
        offs = offsets.astype(jnp.int32)
        ends = jnp.concatenate([offs[1:], jnp.array([seq], jnp.int32)])
        starts2d = jnp.zeros((nb_pad, 1), jnp.int32).at[:num_bags, 0].set(offs)
        ends2d = jnp.zeros((nb_pad, 1), jnp.int32).at[:num_bags, 0].set(ends)

        # Explicit VMEM budget (double-buffered blocks + headroom), kept well
        # under v5e's 16 MiB scoped default and v7x's 64 MiB physical VMEM.
        block_bytes = (seq_pad * 4 + 2 * nb_tile * 4
                       + vocab_pad * embed_pad * itemsize
                       + embed_pad * ncls_pad * itemsize
                       + ncls_pad * 4
                       + nb_tile * ncls_pad * 4
                       + seq_pad * max(vocab_pad, embed_pad) * 4)  # intermediates
        vmem_limit = int(min(max(4 * block_bytes, 8 << 20), 48 << 20))

        out_pad = pl.pallas_call(
            _embedding_bag_fc_kernel,
            out_shape=jax.ShapeDtypeStruct((nb_pad, ncls_pad), jnp.float32),
            grid=grid,
            in_specs=[
                pl.BlockSpec((seq_pad, 1), lambda i: (0, 0)),          # token ids
                pl.BlockSpec((nb_tile, 1), lambda i: (i, 0)),          # bag starts
                pl.BlockSpec((nb_tile, 1), lambda i: (i, 0)),          # bag ends
                pl.BlockSpec((vocab_pad, embed_pad), lambda i: (0, 0)),  # table (VMEM-resident, fetched once)
                pl.BlockSpec((embed_pad, ncls_pad), lambda i: (0, 0)),   # fc weight.T (padded)
                pl.BlockSpec((1, ncls_pad), lambda i: (0, 0)),           # fc bias (padded)
            ],
            out_specs=pl.BlockSpec((nb_tile, ncls_pad), lambda i: (i, 0)),
            compiler_params=pltpu.CompilerParams(
                dimension_semantics=("parallel",),   # bag tiles shard across TCs on v7x
                vmem_limit_bytes=vmem_limit),
        )(text_p, starts2d, ends2d, emb_pad, w_pad, b_pad)

        return out_pad[:num_bags, :num_cls]

    return forward


def _reference(text, offsets, emb_w, fc_w, fc_b):
    seq = text.shape[0]
    num_bags = offsets.shape[0]
    ends = list(offsets[1:]) + [seq]
    rows = []
    for b in range(num_bags):
        s, e = int(offsets[b]), int(ends[b])
        if e > s:
            rows.append(jnp.mean(emb_w[text[s:e]], axis=0))
        else:
            rows.append(jnp.zeros((emb_w.shape[1],), jnp.float32))
    embedded = jnp.stack(rows, axis=0)
    return embedded @ fc_w.T + fc_b


if __name__ == "__main__":
    vocab_size, embed_dim, num_class = 64, 32, 4

    key = jax.random.PRNGKey(0)
    k_emb, k_fc, k_txt = jax.random.split(key, 3)

    # init_weights(): uniform(-0.5, 0.5) for embedding & fc weight, zero bias.
    initrange = 0.5
    emb_w = jax.random.uniform(k_emb, (vocab_size, embed_dim),
                               minval=-initrange, maxval=initrange,
                               dtype=jnp.float32)
    fc_w = jax.random.uniform(k_fc, (num_class, embed_dim),
                              minval=-initrange, maxval=initrange,
                              dtype=jnp.float32)
    fc_b = jnp.zeros((num_class,), jnp.float32)

    # Flat token stream of length 8, two bags: [0:3) and [3:8)  (offsets = [0, 3])
    text = jax.random.randint(k_txt, (8,), 0, vocab_size, dtype=jnp.int32)
    offsets = jnp.array([0, 3], dtype=jnp.int32)

    # f32 params here to keep exact 1e-5 parity with the f32 reference;
    # pass param_dtype=jnp.bfloat16 for the halved-bandwidth bf16 MXU path.
    model = make_text_classifier(emb_w, fc_w, fc_b)

    out = model(text, offsets)
    out = jax.block_until_ready(out)

    ref = _reference(text, offsets, emb_w, fc_w, fc_b)
    assert out.shape == (offsets.shape[0], num_class)
    assert jnp.allclose(out, ref, atol=1e-5, rtol=1e-5), (out, ref)

    print("KERNEL_OK")
</pallas_src>

<mosaic_0001>
module attributes {stable_mosaic.version = 11 : i64} {
  func.func @_embedding_bag_fc_kernel(%arg0: i32, %arg1: memref<8x1xi32, #tpu.memory_space<vmem>>, %arg2: memref<8x1xi32, #tpu.memory_space<vmem>>, %arg3: memref<8x1xi32, #tpu.memory_space<vmem>>, %arg4: memref<128x128xf32, #tpu.memory_space<vmem>>, %arg5: memref<128x128xf32, #tpu.memory_space<vmem>>, %arg6: memref<1x128xf32, #tpu.memory_space<vmem>>, %arg7: memref<8x128xf32, #tpu.memory_space<vmem>>) attributes {dimension_semantics = [#tpu.dimension_semantics<parallel>], iteration_bounds = array<i64: 1>, scalar_prefetch = 0 : i64, scratch_operands = 0 : i64, tpu.core_type = #tpu.core_type<tc>, window_params = [{pipeline_mode = #tpu.pipeline_mode<synchronous>, transform_indices = @transform_0, window_bounds = array<i64: 8, 1>}, {transform_indices = @transform_1, window_bounds = array<i64: 8, 1>}, {transform_indices = @transform_2, window_bounds = array<i64: 8, 1>}, {pipeline_mode = #tpu.pipeline_mode<synchronous>, transform_indices = @transform_3, window_bounds = array<i64: 128, 128>}, {pipeline_mode = #tpu.pipeline_mode<synchronous>, transform_indices = @transform_4, window_bounds = array<i64: 128, 128>}, {pipeline_mode = #tpu.pipeline_mode<synchronous>, transform_indices = @transform_5, window_bounds = array<i64: 1, 128>}, {transform_indices = @transform_6, window_bounds = array<i64: 8, 128>}]} {
    %c0 = arith.constant 0 : index
    %c0_0 = arith.constant 0 : index
    %0 = vector.load %arg1[%c0, %c0_0] : memref<8x1xi32, #tpu.memory_space<vmem>>, vector<8x1xi32>
    %1 = tpu.iota {dimensions = array<i32: 1>} : vector<8x128xi32>
    %2 = vector.broadcast %0 : vector<8x1xi32> to vector<8x128xi32>
    %3 = arith.cmpi eq, %1, %2 : vector<8x128xi32>
    %4 = arith.extui %3 : vector<8x128xi1> to vector<8x128xi32>
    %5 = arith.sitofp %4 : vector<8x128xi32> to vector<8x128xf32>
    %c0_1 = arith.constant 0 : index
    %c0_2 = arith.constant 0 : index
    %6 = vector.load %arg4[%c0_1, %c0_2] : memref<128x128xf32, #tpu.memory_space<vmem>>, vector<128x128xf32>
    %cst = arith.constant dense<0.000000e+00> : vector<8x128xf32>
    %7 = tpu.matmul %5, %6, %cst {dimension_numbers = #tpu.dot_dimension_numbers<[1], [0], [0], [1], [0, 0, 1, 1], [], []>} : vector<8x128xf32>, vector<128x128xf32>, vector<8x128xf32> -> vector<8x128xf32>
    %c0_3 = arith.constant 0 : index
    %c0_4 = arith.constant 0 : index
    %8 = vector.load %arg2[%c0_3, %c0_4] : memref<8x1xi32, #tpu.memory_space<vmem>>, vector<8x1xi32>
    %c0_5 = arith.constant 0 : index
    %c0_6 = arith.constant 0 : index
    %9 = vector.load %arg3[%c0_5, %c0_6] : memref<8x1xi32, #tpu.memory_space<vmem>>, vector<8x1xi32>
    %10 = tpu.iota {dimensions = array<i32: 1>} : vector<8x8xi32>
    %11 = arith.subi %9, %8 : vector<8x1xi32>
    %12 = arith.sitofp %11 : vector<8x1xi32> to vector<8x1xf32>
    %cst_7 = arith.constant 0.000000e+00 : f32
    %13 = vector.broadcast %cst_7 : f32 to vector<8x1xf32>
    %14 = arith.cmpf ogt, %12, %13 : vector<8x1xf32>
    %cst_8 = arith.constant 1.000000e+00 : f32
    %15 = vector.broadcast %cst_8 : f32 to vector<8x1xf32>
    %16 = arith.maximumf %12, %15 : vector<8x1xf32>
    %cst_9 = arith.constant 1.000000e+00 : f32
    %17 = vector.broadcast %cst_9 : f32 to vector<8x1xf32>
    %18 = arith.divf %17, %16 : vector<8x1xf32>
    %cst_10 = arith.constant 0.000000e+00 : f32
    %19 = vector.broadcast %cst_10 : f32 to vector<8x1xf32>
    %20 = arith.select %14, %18, %19 : vector<8x1xi1>, vector<8x1xf32>
    %21 = vector.broadcast %8 : vector<8x1xi32> to vector<8x8xi32>
    %22 = arith.cmpi sge, %10, %21 : vector<8x8xi32>
    %23 = vector.broadcast %9 : vector<8x1xi32> to vector<8x8xi32>
    %24 = arith.cmpi slt, %10, %23 : vector<8x8xi32>
    %25 = arith.andi %22, %24 : vector<8x8xi1>
    %cst_11 = arith.constant 0.000000e+00 : f32
    %26 = vector.shape_cast %20 : vector<8x1xf32> to vector<8x1xf32>
    %27 = vector.broadcast %26 : vector<8x1xf32> to vector<8x8xf32>
    %28 = vector.broadcast %cst_11 : f32 to vector<8x8xf32>
    %29 = arith.select %25, %27, %28 : vector<8x8xi1>, vector<8x8xf32>
    %cst_12 = arith.constant dense<0.000000e+00> : vector<8x128xf32>
    %30 = tpu.matmul %29, %7, %cst_12 {dimension_numbers = #tpu.dot_dimension_numbers<[1], [0], [0], [1], [0, 0, 1, 1], [], []>} : vector<8x8xf32>, vector<8x128xf32>, vector<8x128xf32> -> vector<8x128xf32>
    %c0_13 = arith.constant 0 : index
    %c0_14 = arith.constant 0 : index
    %31 = vector.load %arg5[%c0_13, %c0_14] : memref<128x128xf32, #tpu.memory_space<vmem>>, vector<128x128xf32>
    %cst_15 = arith.constant dense<0.000000e+00> : vector<8x128xf32>
    %32 = tpu.matmul %30, %31, %cst_15 {dimension_numbers = #tpu.dot_dimension_numbers<[1], [0], [0], [1], [0, 0, 1, 1], [], []>} : vector<8x128xf32>, vector<128x128xf32>, vector<8x128xf32> -> vector<8x128xf32>
    %c0_16 = arith.constant 0 : index
    %c0_17 = arith.constant 0 : index
    %33 = vector.load %arg6[%c0_16, %c0_17] : memref<1x128xf32, #tpu.memory_space<vmem>>, vector<1x128xf32>
    %34 = vector.broadcast %33 : vector<1x128xf32> to vector<8x128xf32>
    %35 = arith.addf %32, %34 : vector<8x128xf32>
    %c0_18 = arith.constant 0 : index
    %c0_19 = arith.constant 0 : index
    %36 = vector.load %arg7[%c0_18, %c0_19] : memref<8x128xf32, #tpu.memory_space<vmem>>, vector<8x128xf32>
    tpu.vector_store %arg7[%c0_18, %c0_19], %35 {strides = array<i32>} : memref<8x128xf32, #tpu.memory_space<vmem>>, vector<8x128xf32>,
    return
  }
  func.func @transform_0(%arg0: i32) -> (i32, i32) {
    %c0_i32 = arith.constant 0 : i32
    %c0_i32_0 = arith.constant 0 : i32
    %c0_i32_1 = arith.constant 0 : i32
    return %c0_i32, %c0_i32_0 : i32, i32
  }
  func.func @transform_1(%arg0: i32) -> (i32, i32) {
    %c0_i32 = arith.constant 0 : i32
    %c0_i32_0 = arith.constant 0 : i32
    return %arg0, %c0_i32 : i32, i32
  }
  func.func @transform_2(%arg0: i32) -> (i32, i32) {
    %c0_i32 = arith.constant 0 : i32
    %c0_i32_0 = arith.constant 0 : i32
    return %arg0, %c0_i32 : i32, i32
  }
  func.func @transform_3(%arg0: i32) -> (i32, i32) {
    %c0_i32 = arith.constant 0 : i32
    %c0_i32_0 = arith.constant 0 : i32
    %c0_i32_1 = arith.constant 0 : i32
    return %c0_i32, %c0_i32_0 : i32, i32
  }
  func.func @transform_4(%arg0: i32) -> (i32, i32) {
    %c0_i32 = arith.constant 0 : i32
    %c0_i32_0 = arith.constant 0 : i32
    %c0_i32_1 = arith.constant 0 : i32
    return %c0_i32, %c0_i32_0 : i32, i32
  }
  func.func @transform_5(%arg0: i32) -> (i32, i32) {
    %c0_i32 = arith.constant 0 : i32
    %c0_i32_0 = arith.constant 0 : i32
    %c0_i32_1 = arith.constant 0 : i32
    return %c0_i32, %c0_i32_0 : i32, i32
  }
  func.func @transform_6(%arg0: i32) -> (i32, i32) {
    %c0_i32 = arith.constant 0 : i32
    %c0_i32_0 = arith.constant 0 : i32
    return %arg0, %c0_i32 : i32, i32
  }
}

</mosaic_0001>

<bundles_post_ra>
// kernel: forward.1
= control target key start
LH: loop header
LB: loop body
LE: loop exit
PB: predicated region body
PF: predicated region fallthrough
CT: control target
= control target key end

     0   :  { %11 = vsyncpa [#allocation3], 0  ;;  %s674_s0 = inlined_call_operand.vmem [shape: s32[8,1], index: 0, kind: input, shape index: {}]   ;;  %s675_s1 = inlined_call_operand.vmem [shape: s32[8,1], index: 1, kind: input, shape index: {}]   ;;  %s676_s2 = inlined_call_operand.vmem [shape: s32[8,1], index: 2, kind: input, shape index: {}]   ;;  %s677_s3 = inlined_call_operand.hbm [shape: f32[128,128], index: 3, kind: input, shape index: {}]   ;;  %s678_s4 = inlined_call_operand.hbm [shape: f32[128,128], index: 4, kind: input, shape index: {}]   ;;  %s679_s5 = inlined_call_operand.vmem [shape: f32[1,128], index: 5, kind: input, shape index: {}]   ;;  %s680_s6 = inlined_call_operand.vmem [shape: f32[8,128], index: 6, kind: output, shape index: {}]  }
   0x1   :  { %12 = vsyncpa [#allocation5], 0  ;;  %s568_s21 = smov [#allocation2]   ;;  %s520_s25 = scalar_lea.hbm %s677_s3, 2048 }
   0x2   :  { %s24_s22 = sshll.u32 %s568_s21, 4  ;;  %p521_p0 = scmp.ne.s32.totalorder %s677_s3, %s520_s25  ;;  %s25_s22 = int_to_ptr.vmem [resolvable:$true] %s24_s22 }
   0x3   :  { %p524_p1 = scmp.lt.u32.totalorder %s520_s25, %s677_s3 }
   0x5   :  { %p526_p2 = pnand %p524_p1, %p521_p0 }
   0x7   :  { %529 = shalt.err (!%p526_p2)
}
   0x8   :  { %s530_s30 = scalar_lea.vmem %s25_s22, 2048  ;;  %p535_p4 = scmp.lt.s32.totalorder %s25_s22, %s25_s22 }
   0x9   :  { %p531_p3 = scmp.ne.s32.totalorder %s25_s22, %s530_s30  ;;  %p536_p5 = scmp.lt.s32.totalorder %s530_s30, %s530_s30 }
   0xb   :  { %p537_p6 = por %p536_p5, %p535_p4 }
   0xd   :  { %p538_p7 = pnand %p537_p6, %p531_p3 }
   0xf   :  { %541 = shalt.err (!%p538_p7)
}
  0x10   :  { %s569_s7 = smov 128   ;;  %s570_s8 = smov 8  }
  0x11   :  { %30 = dma.hbm_to_vmem [thread:$0]  %s677_s3, 2048, %s25_s22, [#allocation3], %s569_s7, %s569_s7, %s570_s8  }
  0x12   :  { %s571_s11 = smov [#allocation4]   ;;  %s542_s15 = scalar_lea.hbm %s678_s4, 2048 }
  0x13   :  { %s36_s12 = sshll.u32 %s571_s11, 4  ;;  %p543_p8 = scmp.ne.s32.totalorder %s678_s4, %s542_s15  ;;  %s37_s12 = int_to_ptr.vmem [resolvable:$true] %s36_s12 }
  0x14   :  { %p546_p9 = scmp.lt.u32.totalorder %s542_s15, %s678_s4 }
  0x16   :  { %p548_p10 = pnand %p546_p9, %p543_p8 }
  0x18   :  { %551 = shalt.err (!%p548_p10)
}
  0x19   :  { %s552_s20 = scalar_lea.vmem %s37_s12, 2048  ;;  %p557_p12 = scmp.lt.s32.totalorder %s37_s12, %s37_s12 }
  0x1a   :  { %p553_p11 = scmp.ne.s32.totalorder %s37_s12, %s552_s20  ;;  %p558_p13 = scmp.lt.s32.totalorder %s552_s20, %s552_s20 }
  0x1c   :  { %p559_p0 = por %p558_p13, %p557_p12 }
  0x1e   :  { %p560_p1 = pnand %p559_p0, %p553_p11 }
  0x20   :  { %563 = shalt.err (!%p560_p1)
}
  0x21   :  { %42 = dma.hbm_to_vmem [thread:$0]  %s678_s4, 2048, %s37_s12, [#allocation5], %s569_s7, %s569_s7, %s570_s8  }
  0x22   :  { %564 = dma.done.wait [#allocation3], 2048  }
  0x23   :  { %565 = vsyncadd [#allocation3], 4294965248 }
  0x24   :  { %566 = dma.done.wait [#allocation5], 2048  }
  0x25   :  { %567 = vsyncadd [#allocation5], 4294965248  ;;  %v572_v0 = vmov 0   ;;  %v573_v1 = vmov 0.0|0.0   ;;  %v51_v2 = vld [vmem:[%s674_s0] sm:$0xff]  ;;  %v61_v7 = vld [vmem:[#allocation2 + $0x8] sm:$0xff]  ;;  %v52_v35 = vlaneseq }
  0x26   :  { %516 = vset.pattern.permute.xlu0 %v572_v0  ;;  %517 = vset.pattern.permute.xlu1 %v572_v0  ;;  %v147_v3 = vld [vmem:[%s676_s2] sm:$0xff]  ;;  %v62_v8 = vld [vmem:[#allocation2 + $0x10] sm:$0xff]  ;;  %v63_v10 = vld [vmem:[#allocation2 + $0x18] sm:$0xff]  ;;  %vm574_vm0 = vmmov 0   ;;  %v575_v11 = vmov 0.0   ;;  %v576_v38 = vmov 1.0  }
  0x27   :  { %459 = vmatprep.subr.bf16.mxu0 %v573_v1  ;;  %v146_v4 = vld [vmem:[%s675_s1] sm:$0xff]  ;;  %55 = vperm.xlu0 %516, %v51_v2   ;;  %v463_v13 = vpack.c.bf16 %v63_v10, %v62_v8  ;;  %v65_v16 = vld [vmem:[#allocation2 + $0x28] sm:$0xff]  ;;  %v66_v18 = vld [vmem:[#allocation2 + $0x30] sm:$0xff]  ;;  %v53_v36 = vand.u32 127, %v52_v35  ;;  %vm170_vm5 = vcmask 64512  }
  0x28   :  { %160 = vperm.xlu1 %517, %v147_v3   ;;  %v148_v5 = vsub.s32 %v147_v3, %v146_v4  ;;  %v60_v6 = vld [vmem:[#allocation2] sm:$0xff]  ;;  %416 = vmatprep.mubr.msk.f32.mxu0 %vm574_vm0, %v575_v11  ;;  %v67_v19 = vld [vmem:[#allocation2 + $0x38] sm:$0xff]  ;;  %v69_v22 = vld [vmem:[#allocation2 + $0x48] sm:$0xff] }
  0x29   :  { %v460_v9 = vpack.c.bf16 %v61_v7, %v60_v6  ;;  %419 = vmatprep.subr.mxu1 %v575_v11  ;;  %421 = vmatprep.mubr.msk.f32.mxu1 %vm574_vm0, %v575_v11  ;;  %v64_v15 = vld [vmem:[#allocation2 + $0x20] sm:$0xff]  ;;  %v469_v20 = vpack.c.bf16 %v67_v19, %v66_v18  ;;  %v70_v25 = vld [vmem:[#allocation2 + $0x50] sm:$0xff]  ;;  %v71_v26 = vld [vmem:[#allocation2 + $0x58] sm:$0xff] }
  0x2a   :  { %v149_v12 = vcvt.s32.f32 %v148_v5  ;;  %v466_v17 = vpack.c.bf16 %v65_v16, %v64_v15  ;;  %v68_v21 = vld [vmem:[#allocation2 + $0x40] sm:$0xff]  ;;  %v475_v28 = vpack.c.bf16 %v71_v26, %v70_v25  ;;  %v73_v30 = vld [vmem:[#allocation2 + $0x68] sm:$0xff]  ;;  %v74_v32 = vld [vmem:[#allocation2 + $0x70] sm:$0xff] }
  0x2b   :  { %461 = vmatpush3.bf16.msra.mxu0 %v460_v9  ;;  %156 = vperm.xlu0 %516, %v146_v4   ;;  %v472_v23 = vpack.c.bf16 %v69_v22, %v68_v21  ;;  %v72_v29 = vld [vmem:[#allocation2 + $0x60] sm:$0xff]  ;;  %v75_v33 = vld [vmem:[#allocation2 + $0x78] sm:$0xff]  ;;  %v245_v42 = vld [vmem:[#allocation4 + $0x8] sm:$0xff] }
  0x2c   :  { %v151_v14 = vmax.f32 %v149_v12, 1.0  ;;  %462 = vmatprep.subr.bf16.mxu0 %v573_v1  ;;  %vm150_vm1 = vcmp.gt.f32.partialorder %v149_v12, 0.0  ;;  %v478_v31 = vpack.c.bf16 %v73_v30, %v72_v29  ;;  %v481_v34 = vpack.c.bf16 %v75_v33, %v74_v32  ;;  %v244_v41 = vld [vmem:[#allocation4] sm:$0xff]  ;;  %v246_v46 = vld [vmem:[#allocation4 + $0x10] sm:$0xff]  ;;  %v247_v47 = vld [vmem:[#allocation4 + $0x18] sm:$0xff] }
  0x2d   :  { %v484_v44 = vpack.c.bf16 %v245_v42, %v244_v41  ;;  %v487_v50 = vpack.c.bf16 %v247_v47, %v246_v46  ;;  %v248_v51 = vld [vmem:[#allocation4 + $0x20] sm:$0xff]  ;;  %v249_v52 = vld [vmem:[#allocation4 + $0x28] sm:$0xff]  ;;  %v250_v54 = vld [vmem:[#allocation4 + $0x30] sm:$0xff] }
  0x2e   :  { %518 = vrcp.f32 %v151_v14  ;;  %v490_v53 = vpack.c.bf16 %v249_v52, %v248_v51  ;;  %v251_v55 = vld [vmem:[#allocation4 + $0x38] sm:$0xff]  ;;  %v252_v57 = vld [vmem:[#allocation4 + $0x40] sm:$0xff]  ;;  %v253_v58 = vld [vmem:[#allocation4 + $0x48] sm:$0xff] }
  0x2f   :  { %464 = vmatpush3.bf16.msra.mxu0 %v463_v13  ;;  %v493_v56 = vpack.c.bf16 %v251_v55, %v250_v54  ;;  %v496_v59 = vpack.c.bf16 %v253_v58, %v252_v57  ;;  %v254_v60 = vld [vmem:[#allocation4 + $0x50] sm:$0xff]  ;;  %v255_v61 = vld [vmem:[#allocation4 + $0x58] sm:$0xff]  ;;  %v256_v63 = vld [vmem:[#allocation4 + $0x60] sm:$0xff] }
  0x30   :  { %465 = vmatprep.subr.bf16.mxu0 %v573_v1  ;;  %v499_v62 = vpack.c.bf16 %v255_v61, %v254_v60  ;;  %v257_v0 = vld [vmem:[#allocation4 + $0x68] sm:$0xff]  ;;  %v258_v3 = vld [vmem:[#allocation4 + $0x70] sm:$0xff]  ;;  %v259_v4 = vld [vmem:[#allocation4 + $0x78] sm:$0xff] }
  0x31   :  { %v502_v2 = vpack.c.bf16 %v257_v0, %v256_v63  ;;  %v505_v5 = vpack.c.bf16 %v259_v4, %v258_v3  ;;  %v347_v8 = vld [vmem:[%s679_s5] ss:$0 sm:$0xff] }
  0x33   :  { %467 = vmatpush3.bf16.msra.mxu0 %v466_v17 }
  0x34   :  { %468 = vmatprep.subr.bf16.mxu0 %v573_v1 }
  0x37   :  { %470 = vmatpush3.bf16.msra.mxu0 %v469_v20 }
  0x38   :  { %v519_v24 = vpop.eup %518  ;;  %471 = vmatprep.subr.bf16.mxu0 %v573_v1 }
  0x39   :  { %v154_v27 = vsel %vm150_vm1, %v519_v24, 0.0 }
  0x3a   :  { %166 = vperm.xlu1 %517, %v154_v27  }
  0x3b   :  { %473 = vmatpush3.bf16.msra.mxu0 %v472_v23 }
  0x3c   :  { %474 = vmatprep.subr.bf16.mxu0 %v573_v1 }
  0x3f   :  { %476 = vmatpush3.bf16.msra.mxu0 %v475_v28 }
  0x40   :  { %477 = vmatprep.subr.bf16.mxu0 %v573_v1 }
  0x43   :  { %479 = vmatpush3.bf16.msra.mxu0 %v478_v31 }
  0x44   :  { %480 = vmatprep.subr.bf16.mxu0 %v573_v1 }
  0x47   :  { %482 = vmatpush3.bf16.msra.mxu0 %v481_v34 }
  0xa6   :  { %v56_v37 = vpop.permute.xlu0 %55 }
  0xa7   :  { %vm57_vm2 = vcmp.eq.s32.totalorder %v53_v36, %v56_v37  ;;  %v161_v39 = vpop.permute.xlu1 %160 }
  0xa8   :  { %417 = vmatmul.mubr.msk.f32.vlgmr.msra.gmra.mrb[0].mxu0 %vm57_vm2, %v576_v38  ;;  %vm162_vm3 = vcmp.lt.s32.totalorder %v53_v36, %v161_v39 }
  0xaa   :  { %v157_v40 = vpop.permute.xlu0 %156 }
  0xab   :  { %vm158_vm4 = vcmp.ge.s32.totalorder %v53_v36, %v157_v40 }
  0xac   :  { %vm163_vm6 = vmand %vm158_vm4, %vm162_vm3 }
  0xb9   :  { %v167_v43 = vpop.permute.xlu1 %166 }
  0xba   :  { %v169_v48 = vsel %vm163_vm6, %v167_v43, 0.0 }
 0x17b   :  { %v142_v45 = vpop.f32.mrb[0].mxu0 }
 0x17c   :  { %v418_v49 = vpop.f32.mrb[1].mxu0  ;;  %420 = vmatpush3.msra.mxu1 %v142_v45 }
 0x17d   :  { %422 = vmatmul.mubr.msk.f32.vlgmr.msra.gmra.mrb[0].mxu1 %vm170_vm5, %v169_v48  ;;  %483 = vmatprep.subr.bf16.mxu1 %v573_v1 }
 0x17e   :  { %485 = vmatpush3.bf16.msra.mxu1 %v484_v44  ;;  %456 = vmatprep.mubr.msk.f32.mxu1 %vm574_vm0, %v575_v11 }
 0x17f   :  { %486 = vmatprep.subr.bf16.mxu1 %v573_v1 }
 0x182   :  { %488 = vmatpush3.bf16.msra.mxu1 %v487_v50 }
 0x183   :  { %489 = vmatprep.subr.bf16.mxu1 %v573_v1 }
 0x186   :  { %491 = vmatpush3.bf16.msra.mxu1 %v490_v53 }
 0x187   :  { %492 = vmatprep.subr.bf16.mxu1 %v573_v1 }
 0x18a   :  { %494 = vmatpush3.bf16.msra.mxu1 %v493_v56 }
 0x18b   :  { %495 = vmatprep.subr.bf16.mxu1 %v573_v1 }
 0x18e   :  { %497 = vmatpush3.bf16.msra.mxu1 %v496_v59 }
 0x18f   :  { %498 = vmatprep.subr.bf16.mxu1 %v573_v1 }
 0x192   :  { %500 = vmatpush3.bf16.msra.mxu1 %v499_v62 }
 0x193   :  { %501 = vmatprep.subr.bf16.mxu1 %v573_v1 }
 0x196   :  { %503 = vmatpush3.bf16.msra.mxu1 %v502_v2 }
 0x197   :  { %504 = vmatprep.subr.bf16.mxu1 %v573_v1 }
 0x19a   :  { %506 = vmatpush3.bf16.msra.mxu1 %v505_v5 }
 0x250   :  { %v240_v6 = vpop.f32.mrb[0].mxu1 }
 0x251   :  { %v423_v7 = vpop.f32.mrb[1].mxu1  ;;  %457 = vmatmul.mubr.f32.vlgmr.msra.gmra.mrb[2].mxu1 %v240_v6 }
 0x324   :  { %v333_v9 = vpop.f32.mrb[2].mxu1 }
 0x325   :  { %v334_v10 = vadd.f32 %v347_v8, %v333_v9  ;;  %v458_v11 = vpop.f32.mrb[3].mxu1 }
 0x327   :  { %337 = vst [vmem:[%s680_s6] sm:$0xff] %v334_v10 }
 0x328   :  { %342 = vsyncpa [#allocation3], 1 }
 0x329   :  { %343 = vsyncpa [#allocation5], 1 }

</bundles_post_ra>
